<compile_context>
chip_gen: v5e
topology: v5e:2x2
jax: 0.10.0
libtpu: 0.0.40
codegen_flags: <defaults>
</compile_context>

<pallas_src>
import jax
import jax.numpy as jnp
from jax.experimental import pallas as pl
from jax.experimental.pallas import tpu as pltpu


LANES = 128
ROW_ALIGN = 16      # bf16 packs 2 rows per sublane: keep batch tiles (16,128)-aligned
NEG_INF = -1e30     # finite sink for padded head lanes


def _round_up(x, m):
    return (x + m - 1) // m * m


def _actor_kernel(x_ref,
                  w1_ref, b1_ref,
                  w2_ref, b2_ref,
                  w3_ref, b3_ref,
                  w4_ref, b4_ref,
                  out_ref):
    """One batch tile: 4 matmuls (bf16 operands, f32 accumulate) + tanh + softmax."""

    def dense(h, w_ref, b_ref):
        # bf16 matmul operands, f32 accumulation. The cast is a no-op for the
        # (already bf16) input tile and only hits the f32 tanh outputs.
        return jnp.dot(h.astype(w_ref.dtype), w_ref[...],
                       preferred_element_type=jnp.float32) + b_ref[...]

    h = jnp.tanh(dense(x_ref[...], w1_ref, b1_ref))
    h = jnp.tanh(dense(h, w2_ref, b2_ref))
    h = jnp.tanh(dense(h, w3_ref, b3_ref))
    # Padded columns of w4 are zero and b4 is -1e30 there, so padded logits
    # sink automatically -- no per-tile iota/compare/select needed.
    logits = dense(h, w4_ref, b4_ref)                 # (tile_b, a_pad), lane-dense

    # Numerically stable softmax along the last axis.
    m = jnp.max(logits, axis=-1, keepdims=True)
    e = jnp.exp(logits - m)
    denom = jnp.sum(e, axis=-1, keepdims=True)
    # EUP approx vrcp (otherwise-idle slot) + one Newton step on the idle VPU
    # -> near-exact reciprocal at negligible cost.
    inv = pl.reciprocal(denom, approx=True)
    inv = inv * (2.0 - denom * inv)
    out_ref[...] = (e * inv).astype(out_ref.dtype)


def actor_forward(state, params, *, tile_b=2048, out_dtype=jnp.float32):
    """state: (B, state_dim) float. params: dict of W^T (in,out) bf16, bias (1,out) f32."""
    B, state_dim = state.shape
    h1 = params["w1"].shape[1]
    h2 = params["w2"].shape[1]
    h3 = params["w3"].shape[1]
    action_dim = params["w4"].shape[1]
    a_pad = _round_up(action_dim, LANES)

    # Batch tiling: per-tile compute is ~3 MFLOP (nanoseconds on the MXU) so
    # the ~0.35us fixed per-grid-step overhead dominates -> use big tiles.
    # Cap the tile so a large batch still produces ~8 steps (>=4 per
    # TensorCore on v7x megacore) so the BlockSpec pipeline actually overlaps.
    # tb <= 2048 keeps the double-buffered footprint at a few MiB, well inside
    # every generation's scoped-VMEM default (32 MiB on v7x).
    target_steps = 8
    tb = min(tile_b, _round_up(pl.cdiv(B, target_steps), ROW_ALIGN))
    tb = max(ROW_ALIGN, _round_up(tb, ROW_ALIGN))
    b_pad = _round_up(B, tb)
    grid = (b_pad // tb,)

    # Stream the state as bf16: it is cast to bf16 for the MXU anyway; this
    # halves the input HBM read and its VMEM double buffer.
    x = state.astype(jnp.bfloat16)
    if b_pad != B:
        x = jnp.pad(x, ((0, b_pad - B), (0, 0)))

    # Lane-dense head: pad w4 columns with zeros and b4 with a large negative
    # constant so padded logits vanish from the softmax without in-kernel work.
    w4, b4 = params["w4"], params["b4"]
    if a_pad != action_dim:
        w4 = jnp.pad(w4, ((0, 0), (0, a_pad - action_dim)))
        b4 = jnp.pad(b4, ((0, 0), (0, a_pad - action_dim)), constant_values=NEG_INF)

    def resident(shape):
        # Full-array block whose index never changes -> fetched once, stays in
        # VMEM across all grid steps. Single-buffered: a 2nd copy is dead.
        return pl.BlockSpec(shape, lambda i: (0, 0), pipeline_mode=pl.Buffered(1))

    out = pl.pallas_call(
        _actor_kernel,
        out_shape=jax.ShapeDtypeStruct((b_pad, a_pad), out_dtype),
        grid=grid,
        in_specs=[
            pl.BlockSpec((tb, state_dim), lambda i: (i, 0)),   # streamed state tile
            resident((state_dim, h1)), resident((1, h1)),
            resident((h1, h2)),        resident((1, h2)),
            resident((h2, h3)),        resident((1, h3)),
            resident((h3, a_pad)),     resident((1, a_pad)),
        ],
        out_specs=pl.BlockSpec((tb, a_pad), lambda i: (i, 0)), # streamed output tile
        compiler_params=pltpu.CompilerParams(
            dimension_semantics=("parallel",)),                # megacore batch split
    )(x,
      params["w1"], params["b1"],
      params["w2"], params["b2"],
      params["w3"], params["b3"],
      w4, b4)

    # TODO(synk): for the real PPO consumer, fuse the Categorical sample +
    # log-prob into the kernel (pltpu.prng_seed / prng_random_bits) so the
    # writeback shrinks to (B,1)/(B,2) instead of the padded (b_pad,128) slab
    # plus this slice; biggest relative win on v5e's HBM bandwidth.
    return out[:B, :action_dim]


# ----------------------------- init & reference -----------------------------

def orthogonal(key, out_dim, in_dim, gain=1.0):
    """Orthogonal init matching nn.init.orthogonal_ semantics (sign-corrected QR)."""
    rows, cols = out_dim, in_dim
    a = jax.random.normal(key, (max(rows, cols), min(rows, cols)), dtype=jnp.float32)
    q, r = jnp.linalg.qr(a)
    d = jnp.diagonal(r)
    q = q * jnp.where(d >= 0, 1.0, -1.0)[None, :]
    if rows < cols:
        q = q.T
    return gain * q[:rows, :cols]


def make_params(key, state_dim, hidden, action_dim, *, weight_dtype=jnp.bfloat16):
    k1, k2, k3, k4 = jax.random.split(key, 4)
    dims = [(hidden[0], state_dim, 1.0, k1),
            (hidden[1], hidden[0], 1.0, k2),
            (hidden[2], hidden[1], 1.0, k3),
            (action_dim, hidden[2], 0.01, k4)]
    params = {}
    for i, (out_d, in_d, gain, kk) in enumerate(dims, start=1):
        w = orthogonal(kk, out_d, in_d, gain=gain)               # (out, in) torch layout
        params[f"w{i}"] = jnp.asarray(w.T, dtype=weight_dtype)   # (in, out) for x @ W
        params[f"b{i}"] = jnp.zeros((1, out_d), jnp.float32)     # bias row, f32
    return params


def actor_reference(state, params):
    """Pure-JAX reference with the same bf16-operand / f32-accumulate contract."""
    def dense(h, w, b):
        return jnp.dot(h.astype(w.dtype), w, preferred_element_type=jnp.float32) + b
    x = jnp.tanh(dense(state.astype(jnp.float32), params["w1"], params["b1"]))
    x = jnp.tanh(dense(x, params["w2"], params["b2"]))
    x = jnp.tanh(dense(x, params["w3"], params["b3"]))
    logits = dense(x, params["w4"], params["b4"])
    return jax.nn.softmax(logits, axis=-1)


if __name__ == "__main__":
    key = jax.random.PRNGKey(0)
    k_state, k_big, k_params = jax.random.split(key, 3)

    state_dim = 8
    hidden = (32, 32, 32)
    action_dim = 4
    params = make_params(k_params, state_dim, hidden, action_dim)

    # Small shape consistent with the module (single tile, grid=1, row padding).
    B = 2
    state = jax.random.normal(k_state, (B, state_dim), dtype=jnp.float32)
    out = jax.block_until_ready(actor_forward(state, params))
    ref = actor_reference(state, params)
    assert out.shape == (B, action_dim)
    assert bool(jnp.allclose(jnp.sum(out, axis=-1), 1.0, atol=2e-3))
    assert bool(jnp.allclose(out, ref, atol=2e-3))

    # Rollout-sized batch: exercises grid > 1 (8 pipelined steps), resident
    # single-buffered weights, and the "parallel" batch axis.
    Bb = 512
    big_state = jax.random.normal(k_big, (Bb, state_dim), dtype=jnp.float32)
    big_out = jax.block_until_ready(actor_forward(big_state, params))
    big_ref = actor_reference(big_state, params)
    assert big_out.shape == (Bb, action_dim)
    assert bool(jnp.allclose(jnp.sum(big_out, axis=-1), 1.0, atol=2e-3))
    assert bool(jnp.allclose(big_out, big_ref, atol=2e-3))

    print("KERNEL_OK")
</pallas_src>

<mosaic_0001>
module attributes {stable_mosaic.version = 11 : i64} {
  func.func @_actor_kernel(%arg0: i32, %arg1: memref<16x8xbf16, #tpu.memory_space<vmem>>, %arg2: memref<8x32xbf16, #tpu.memory_space<vmem>>, %arg3: memref<1x32xf32, #tpu.memory_space<vmem>>, %arg4: memref<32x32xbf16, #tpu.memory_space<vmem>>, %arg5: memref<1x32xf32, #tpu.memory_space<vmem>>, %arg6: memref<32x32xbf16, #tpu.memory_space<vmem>>, %arg7: memref<1x32xf32, #tpu.memory_space<vmem>>, %arg8: memref<32x128xbf16, #tpu.memory_space<vmem>>, %arg9: memref<1x128xf32, #tpu.memory_space<vmem>>, %arg10: memref<16x128xf32, #tpu.memory_space<vmem>>) attributes {dimension_semantics = [#tpu.dimension_semantics<parallel>], iteration_bounds = array<i64: 1>, scalar_prefetch = 0 : i64, scratch_operands = 0 : i64, tpu.core_type = #tpu.core_type<tc>, window_params = [{transform_indices = @transform_0, window_bounds = array<i64: 16, 8>}, {pipeline_mode = #tpu.pipeline_mode<synchronous>, transform_indices = @transform_1, window_bounds = array<i64: 8, 32>}, {pipeline_mode = #tpu.pipeline_mode<synchronous>, transform_indices = @transform_2, window_bounds = array<i64: 1, 32>}, {pipeline_mode = #tpu.pipeline_mode<synchronous>, transform_indices = @transform_3, window_bounds = array<i64: 32, 32>}, {pipeline_mode = #tpu.pipeline_mode<synchronous>, transform_indices = @transform_4, window_bounds = array<i64: 1, 32>}, {pipeline_mode = #tpu.pipeline_mode<synchronous>, transform_indices = @transform_5, window_bounds = array<i64: 32, 32>}, {pipeline_mode = #tpu.pipeline_mode<synchronous>, transform_indices = @transform_6, window_bounds = array<i64: 1, 32>}, {pipeline_mode = #tpu.pipeline_mode<synchronous>, transform_indices = @transform_7, window_bounds = array<i64: 32, 128>}, {pipeline_mode = #tpu.pipeline_mode<synchronous>, transform_indices = @transform_8, window_bounds = array<i64: 1, 128>}, {transform_indices = @transform_9, window_bounds = array<i64: 16, 128>}]} {
    %c0 = arith.constant 0 : index
    %c0_0 = arith.constant 0 : index
    %0 = vector.load %arg1[%c0, %c0_0] : memref<16x8xbf16, #tpu.memory_space<vmem>>, vector<16x8xbf16>
    %c0_1 = arith.constant 0 : index
    %c0_2 = arith.constant 0 : index
    %1 = vector.load %arg2[%c0_1, %c0_2] : memref<8x32xbf16, #tpu.memory_space<vmem>>, vector<8x32xbf16>
    %cst = arith.constant dense<0.000000e+00> : vector<16x32xf32>
    %2 = tpu.matmul %0, %1, %cst {dimension_numbers = #tpu.dot_dimension_numbers<[1], [0], [0], [1], [0, 0, 1, 1], [], []>} : vector<16x8xbf16>, vector<8x32xbf16>, vector<16x32xf32> -> vector<16x32xf32>
    %c0_3 = arith.constant 0 : index
    %c0_4 = arith.constant 0 : index
    %3 = vector.load %arg3[%c0_3, %c0_4] : memref<1x32xf32, #tpu.memory_space<vmem>>, vector<1x32xf32>
    %4 = vector.broadcast %3 : vector<1x32xf32> to vector<16x32xf32>
    %5 = arith.addf %2, %4 : vector<16x32xf32>
    %6 = math.tanh %5 : vector<16x32xf32>
    %7 = arith.truncf %6 : vector<16x32xf32> to vector<16x32xbf16>
    %c0_5 = arith.constant 0 : index
    %c0_6 = arith.constant 0 : index
    %8 = vector.load %arg4[%c0_5, %c0_6] : memref<32x32xbf16, #tpu.memory_space<vmem>>, vector<32x32xbf16>
    %cst_7 = arith.constant dense<0.000000e+00> : vector<16x32xf32>
    %9 = tpu.matmul %7, %8, %cst_7 {dimension_numbers = #tpu.dot_dimension_numbers<[1], [0], [0], [1], [0, 0, 1, 1], [], []>} : vector<16x32xbf16>, vector<32x32xbf16>, vector<16x32xf32> -> vector<16x32xf32>
    %c0_8 = arith.constant 0 : index
    %c0_9 = arith.constant 0 : index
    %10 = vector.load %arg5[%c0_8, %c0_9] : memref<1x32xf32, #tpu.memory_space<vmem>>, vector<1x32xf32>
    %11 = vector.broadcast %10 : vector<1x32xf32> to vector<16x32xf32>
    %12 = arith.addf %9, %11 : vector<16x32xf32>
    %13 = math.tanh %12 : vector<16x32xf32>
    %14 = arith.truncf %13 : vector<16x32xf32> to vector<16x32xbf16>
    %c0_10 = arith.constant 0 : index
    %c0_11 = arith.constant 0 : index
    %15 = vector.load %arg6[%c0_10, %c0_11] : memref<32x32xbf16, #tpu.memory_space<vmem>>, vector<32x32xbf16>
    %cst_12 = arith.constant dense<0.000000e+00> : vector<16x32xf32>
    %16 = tpu.matmul %14, %15, %cst_12 {dimension_numbers = #tpu.dot_dimension_numbers<[1], [0], [0], [1], [0, 0, 1, 1], [], []>} : vector<16x32xbf16>, vector<32x32xbf16>, vector<16x32xf32> -> vector<16x32xf32>
    %c0_13 = arith.constant 0 : index
    %c0_14 = arith.constant 0 : index
    %17 = vector.load %arg7[%c0_13, %c0_14] : memref<1x32xf32, #tpu.memory_space<vmem>>, vector<1x32xf32>
    %18 = vector.broadcast %17 : vector<1x32xf32> to vector<16x32xf32>
    %19 = arith.addf %16, %18 : vector<16x32xf32>
    %20 = math.tanh %19 : vector<16x32xf32>
    %21 = arith.truncf %20 : vector<16x32xf32> to vector<16x32xbf16>
    %c0_15 = arith.constant 0 : index
    %c0_16 = arith.constant 0 : index
    %22 = vector.load %arg8[%c0_15, %c0_16] : memref<32x128xbf16, #tpu.memory_space<vmem>>, vector<32x128xbf16>
    %cst_17 = arith.constant dense<0.000000e+00> : vector<16x128xf32>
    %23 = tpu.matmul %21, %22, %cst_17 {dimension_numbers = #tpu.dot_dimension_numbers<[1], [0], [0], [1], [0, 0, 1, 1], [], []>} : vector<16x32xbf16>, vector<32x128xbf16>, vector<16x128xf32> -> vector<16x128xf32>
    %c0_18 = arith.constant 0 : index
    %c0_19 = arith.constant 0 : index
    %24 = vector.load %arg9[%c0_18, %c0_19] : memref<1x128xf32, #tpu.memory_space<vmem>>, vector<1x128xf32>
    %25 = vector.broadcast %24 : vector<1x128xf32> to vector<16x128xf32>
    %26 = arith.addf %23, %25 : vector<16x128xf32>
    %cst_20 = arith.constant dense<0xFF800000> : vector<16xf32>
    %27 = vector.multi_reduction <maximumf>, %26, %cst_20 [1] : vector<16x128xf32> to vector<16xf32>
    %28 = vector.shape_cast %27 : vector<16xf32> to vector<16x1xf32>
    %29 = vector.broadcast %28 : vector<16x1xf32> to vector<16x128xf32>
    %30 = arith.subf %26, %29 : vector<16x128xf32>
    %31 = math.exp %30 : vector<16x128xf32>
    %cst_21 = arith.constant dense<0.000000e+00> : vector<16xf32>
    %32 = vector.multi_reduction <add>, %31, %cst_21 [1] : vector<16x128xf32> to vector<16xf32>
    %33 = vector.shape_cast %32 : vector<16xf32> to vector<16x1xf32>
    %34 = tpu.reciprocal %33 {approx = true} : vector<16x1xf32> -> vector<16x1xf32>
    %35 = arith.mulf %33, %34 : vector<16x1xf32>
    %cst_22 = arith.constant 2.000000e+00 : f32
    %36 = vector.broadcast %cst_22 : f32 to vector<16x1xf32>
    %37 = arith.subf %36, %35 : vector<16x1xf32>
    %38 = arith.mulf %34, %37 : vector<16x1xf32>
    %39 = vector.broadcast %38 : vector<16x1xf32> to vector<16x128xf32>
    %40 = arith.mulf %31, %39 : vector<16x128xf32>
    %c0_23 = arith.constant 0 : index
    %c0_24 = arith.constant 0 : index
    %41 = vector.load %arg10[%c0_23, %c0_24] : memref<16x128xf32, #tpu.memory_space<vmem>>, vector<16x128xf32>
    tpu.vector_store %arg10[%c0_23, %c0_24], %40 {strides = array<i32>} : memref<16x128xf32, #tpu.memory_space<vmem>>, vector<16x128xf32>,
    return
  }
  func.func @transform_0(%arg0: i32) -> (i32, i32) {
    %c0_i32 = arith.constant 0 : i32
    %c0_i32_0 = arith.constant 0 : i32
    return %arg0, %c0_i32 : i32, i32
  }
  func.func @transform_1(%arg0: i32) -> (i32, i32) {
    %c0_i32 = arith.constant 0 : i32
    %c0_i32_0 = arith.constant 0 : i32
    %c0_i32_1 = arith.constant 0 : i32
    return %c0_i32, %c0_i32_0 : i32, i32
  }
  func.func @transform_2(%arg0: i32) -> (i32, i32) {
    %c0_i32 = arith.constant 0 : i32
    %c0_i32_0 = arith.constant 0 : i32
    %c0_i32_1 = arith.constant 0 : i32
    return %c0_i32, %c0_i32_0 : i32, i32
  }
  func.func @transform_3(%arg0: i32) -> (i32, i32) {
    %c0_i32 = arith.constant 0 : i32
    %c0_i32_0 = arith.constant 0 : i32
    %c0_i32_1 = arith.constant 0 : i32
    return %c0_i32, %c0_i32_0 : i32, i32
  }
  func.func @transform_4(%arg0: i32) -> (i32, i32) {
    %c0_i32 = arith.constant 0 : i32
    %c0_i32_0 = arith.constant 0 : i32
    %c0_i32_1 = arith.constant 0 : i32
    return %c0_i32, %c0_i32_0 : i32, i32
  }
  func.func @transform_5(%arg0: i32) -> (i32, i32) {
    %c0_i32 = arith.constant 0 : i32
    %c0_i32_0 = arith.constant 0 : i32
    %c0_i32_1 = arith.constant 0 : i32
    return %c0_i32, %c0_i32_0 : i32, i32
  }
  func.func @transform_6(%arg0: i32) -> (i32, i32) {
    %c0_i32 = arith.constant 0 : i32
    %c0_i32_0 = arith.constant 0 : i32
    %c0_i32_1 = arith.constant 0 : i32
    return %c0_i32, %c0_i32_0 : i32, i32
  }
  func.func @transform_7(%arg0: i32) -> (i32, i32) {
    %c0_i32 = arith.constant 0 : i32
    %c0_i32_0 = arith.constant 0 : i32
    %c0_i32_1 = arith.constant 0 : i32
    return %c0_i32, %c0_i32_0 : i32, i32
  }
  func.func @transform_8(%arg0: i32) -> (i32, i32) {
    %c0_i32 = arith.constant 0 : i32
    %c0_i32_0 = arith.constant 0 : i32
    %c0_i32_1 = arith.constant 0 : i32
    return %c0_i32, %c0_i32_0 : i32, i32
  }
  func.func @transform_9(%arg0: i32) -> (i32, i32) {
    %c0_i32 = arith.constant 0 : i32
    %c0_i32_0 = arith.constant 0 : i32
    return %arg0, %c0_i32 : i32, i32
  }
}

</mosaic_0001>

<bundles_post_ra>
// kernel: tpu_custom_call.1
= control target key start
LH: loop header
LB: loop body
LE: loop exit
PB: predicated region body
PF: predicated region fallthrough
CT: control target
= control target key end

     0   :  { %14 = vsyncpa [#allocation3], 0  ;;  %s629_s0 = inlined_call_operand.vmem [shape: bf16[16,8], index: 0, kind: input, shape index: {}]   ;;  %s630_s1 = inlined_call_operand.hbm [shape: bf16[8,32], index: 1, kind: input, shape index: {}]   ;;  %s631_s2 = inlined_call_operand.hbm [shape: f32[1,32], index: 2, kind: input, shape index: {}]   ;;  %s632_s3 = inlined_call_operand.hbm [shape: bf16[32,32], index: 3, kind: input, shape index: {}]   ;;  %s633_s4 = inlined_call_operand.hbm [shape: f32[1,32], index: 4, kind: input, shape index: {}]   ;;  %s634_s5 = inlined_call_operand.vmem [shape: bf16[32,32], index: 5, kind: input, shape index: {}]   ;;  %s635_s6 = inlined_call_operand.vmem [shape: f32[1,32], index: 6, kind: input, shape index: {}]   ;;  %s636_s7 = inlined_call_operand.hbm [shape: bf16[32,128], index: 7, kind: input, shape index: {}]   ;;  %s637_s8 = inlined_call_operand.vmem [shape: f32[1,128], index: 8, kind: input, shape index: {}]   ;;  %s638_s9 = inlined_call_operand.hbm [shape: f32[16,128], index: 9, kind: output, shape index: {}]  }
   0x1   :  { %15 = vsyncpa [#allocation6], 0 }
   0x2   :  { %16 = vsyncpa [#allocation9], 0  ;;  %s36_s11 = sshll.u32 %s631_s2, 4  ;;  %s37_s11 = int_to_ptr.hbm [resolvable:$true] %s36_s11 }
   0x3   :  { %17 = vsyncpa [#allocation4], 0  ;;  %s533_s12 = smov [#allocation5]   ;;  %s60_s16 = sshll.u32 %s633_s4, 4  ;;  %s61_s16 = int_to_ptr.hbm [resolvable:$true] %s60_s16 }
   0x4   :  { %s38_s13 = sshll.u32 %s533_s12, 4  ;;  %s534_s17 = smov [#allocation8]   ;;  %s39_s13 = int_to_ptr.vmem [resolvable:$true] %s38_s13 }
   0x5   :  { %41 = dma.hbm_to_vmem [thread:$0]  %s37_s11, 16, %s39_s13, [#allocation6]  }
   0x6   :  { %s62_s18 = sshll.u32 %s534_s17, 4  ;;  %s25_s21 = sshll.u32 %s630_s1, 4  ;;  %s63_s18 = int_to_ptr.vmem [resolvable:$true] %s62_s18  ;;  %s26_s21 = int_to_ptr.hbm [resolvable:$true] %s25_s21 }
   0x7   :  { %65 = dma.hbm_to_vmem [thread:$0]  %s61_s16, 16, %s63_s18, [#allocation9]  }
   0x8   :  { %s46_s23 = sshll.u32 %s632_s3, 4  ;;  %s535_s24 = smov [#allocation2]   ;;  %s47_s23 = int_to_ptr.hbm [resolvable:$true] %s46_s23 }
   0x9   :  { %s27_s25 = sshll.u32 %s535_s24, 4  ;;  %s536_s4 = smov [#allocation7]   ;;  %s28_s25 = int_to_ptr.vmem [resolvable:$true] %s27_s25 }
   0xa   :  { %30 = dma.hbm_to_vmem [thread:$0]  %s26_s21, 64, %s28_s25, [#allocation3]  }
   0xb   :  { %s48_s26 = sshll.u32 %s536_s4, 4  ;;  %s537_s27 = smov 64   ;;  %s49_s26 = int_to_ptr.vmem [resolvable:$true] %s48_s26 }
   0xc   :  { %s538_s28 = smov 4   ;;  %s74_s30 = sshll.u32 %s636_s7, 4  ;;  %s75_s30 = int_to_ptr.hbm [resolvable:$true] %s74_s30 }
   0xd   :  { %54 = dma.hbm_to_vmem [thread:$0]  %s47_s23, 256, %s49_s26, [#allocation6], %s537_s27, %s537_s27, %s538_s28  }
   0xe   :  { %s539_s10 = smov [#allocation10]  }
   0xf   :  { %s76_s11 = sshll.u32 %s539_s10, 4  ;;  %s77_s11 = int_to_ptr.vmem [resolvable:$true] %s76_s11 }
  0x10   :  { %82 = dma.hbm_to_vmem [thread:$0]  %s75_s30, 256, %s77_s11, [#allocation9], %s537_s27, %s537_s27, %s538_s28  }
  0x11   :  { %525 = dma.done.wait [#allocation3], 64  }
  0x12   :  { %526 = vsyncadd [#allocation3], 4294967232 }
  0x13   :  { %527 = dma.done.wait [#allocation6], 272  }
  0x14   :  { %528 = vsyncadd [#allocation6], 4294967024 }
  0x15   :  { %529 = dma.done.wait [#allocation9], 272  }
  0x16   :  { %530 = vsyncadd [#allocation9], 4294967024  ;;  %vm122_vm0 = vcmask 1043456   ;;  %v108_v0 = vld [vmem:[#allocation2] sm:$0xf]  ;;  %vm118_vm1 = vcmask 64512  }
  0x17   :  { %v124_v1 = vsel %vm122_vm0, %v108_v0, 0  ;;  %v340_v2 = vld [vmem:[%s629_s0] sm:$0xff]  ;;  %v342_v3 = vld [vmem:[#allocation7 + $0x8] sm:$0xff]  ;;  %vm163_vm2 = vcmask 261120   ;;  %v358_v16 = vld [vmem:[#allocation8] ss:$0 sm:$0xff] }
  0x18   :  { %133 = vmatpush.bf16.msra.mxu0 %v124_v1  ;;  %173 = vmatpush.bf16.msra.mxu1 %v342_v3  ;;  %v341_v4 = vld [vmem:[#allocation7] sm:$0xff]  ;;  %v357_v6 = vld [vmem:[#allocation5] ss:$0 sm:$0xff]  ;;  %v345_v24 = vld [vmem:[#allocation10] sm:$0xff]  ;;  %s293_s20 = sshll.u32 %s638_s9, 4  ;;  %s541_s21 = smov 128   ;;  %s294_s20 = int_to_ptr.hbm [resolvable:$true] %s293_s20 }
  0x19   :  { %v344_v13 = vld [vmem:[%s634_s5 + $0x8] sm:$0xff]  ;;  %v343_v14 = vld [vmem:[%s634_s5] sm:$0xff]  ;;  %s542_s2 = smov 8  }
  0x1a   :  { %213 = vmatpush.bf16.msra.mxu2 %v344_v13  ;;  %v346_v23 = vld [vmem:[#allocation10 + $0x8] sm:$0xff] }
  0x1b   :  { %312 = vmatmul.msk.bf16.vlgmr.msra.gmra.mxu0 %vm118_vm1, %v340_v2  ;;  %253 = vmatpush.bf16.msra.mxu3 %v346_v23  ;;  %v359_v26 = vld [vmem:[%s635_s6] ss:$0 sm:$0xff]  ;;  %s540_s6 = smov [#allocation11]  }
  0x1c   :  { %174 = vmatpush.bf16.msra.mxu1 %v341_v4  ;;  %v360_v33 = vld [vmem:[%s637_s8] ss:$0 sm:$0xff]  ;;  %s291_s8 = sshll.u32 %s540_s6, 4  ;;  %s292_s8 = int_to_ptr.vmem [resolvable:$true] %s291_s8 }
  0x1e   :  { %214 = vmatpush.bf16.msra.mxu2 %v343_v14 }
  0x1f   :  { %254 = vmatpush.bf16.msra.mxu3 %v345_v24 }
  0x98   :  { %v135_v5 = vpop.f32.mrf.mxu0 }
  0x99   :  { %v136_v7 = vadd.f32 %v357_v6, %v135_v5 }
  0x9b   :  { %361 = vtanh.f32 %v136_v7 }
  0xa0   :  { %v137_v8 = vpop.f32.mrf.mxu0 }
  0xa1   :  { %v138_v9 = vadd.f32 %v357_v6, %v137_v8  ;;  %v362_v10 = vpop.eup %361 }
  0xa3   :  { %363 = vtanh.f32 %v138_v9 }
  0xa9   :  { %v364_v11 = vpop.eup %363 }
  0xaa   :  { %v142_v12 = vpack.c.bf16 %v364_v11, %v362_v10 }
  0xac   :  { %321 = vmatmul.msk.bf16.vlgmr.msra.gmra.mxu1 %vm163_vm2, %v142_v12 }
 0x129   :  { %v176_v15 = vpop.f32.mrf.mxu1 }
 0x12a   :  { %v177_v17 = vadd.f32 %v358_v16, %v176_v15 }
 0x12c   :  { %365 = vtanh.f32 %v177_v17 }
 0x131   :  { %v178_v18 = vpop.f32.mrf.mxu1 }
 0x132   :  { %v179_v19 = vadd.f32 %v358_v16, %v178_v18  ;;  %v366_v20 = vpop.eup %365 }
 0x134   :  { %367 = vtanh.f32 %v179_v19 }
 0x13a   :  { %v368_v21 = vpop.eup %367 }
 0x13b   :  { %v183_v22 = vpack.c.bf16 %v368_v21, %v366_v20 }
 0x13d   :  { %330 = vmatmul.msk.bf16.vlgmr.msra.gmra.mxu2 %vm163_vm2, %v183_v22 }
 0x1c0   :  { %v216_v25 = vpop.f32.mrf.mxu2 }
 0x1c1   :  { %v217_v27 = vadd.f32 %v359_v26, %v216_v25 }
 0x1c3   :  { %369 = vtanh.f32 %v217_v27 }
 0x1c8   :  { %v218_v28 = vpop.f32.mrf.mxu2 }
 0x1c9   :  { %v219_v29 = vadd.f32 %v359_v26, %v218_v28  ;;  %v370_v30 = vpop.eup %369 }
 0x1cb   :  { %371 = vtanh.f32 %v219_v29 }
 0x1d1   :  { %v372_v31 = vpop.eup %371 }
 0x1d2   :  { %v223_v32 = vpack.c.bf16 %v372_v31, %v370_v30 }
 0x1d4   :  { %339 = vmatmul.msk.bf16.vlgmr.msra.gmra.mxu3 %vm163_vm2, %v223_v32 }
 0x257   :  { %v256_v34 = vpop.f32.mrf.mxu3 }
 0x258   :  { %v257_v35 = vadd.f32 %v360_v33, %v256_v34 }
 0x25a   :  { %261 = vmax.xlane.f32.xlu0 %v257_v35 }
 0x25f   :  { %v258_v36 = vpop.f32.mrf.mxu3 }
 0x260   :  { %v259_v37 = vadd.f32 %v360_v33, %v258_v36 }
 0x262   :  { %263 = vmax.xlane.f32.xlu0 %v259_v37 }
 0x2cd   :  { %v262_v38 = vpop.xlane.xlu0 %261 }
 0x2ce   :  { %v265_v39 = vsub.f32 %v257_v35, %v262_v38 }
 0x2d0   :  { %v267_v40 = vmul.f32 1.442695, %v265_v39 }
 0x2d2   :  { %373 = vpow2.f32 %v267_v40 }
 0x2d5   :  { %v264_v41 = vpop.xlane.xlu0 %263 }
 0x2d6   :  { %v266_v42 = vsub.f32 %v259_v37, %v264_v41 }
 0x2d8   :  { %v374_v43 = vpop.eup %373  ;;  %v269_v44 = vmul.f32 1.442695, %v266_v42 }
 0x2d9   :  { %271 = vadd.xlane.f32.xlu1 %v374_v43 }
 0x2da   :  { %375 = vpow2.f32 %v269_v44 }
 0x2e0   :  { %v376_v45 = vpop.eup %375 }
 0x2e1   :  { %273 = vadd.xlane.f32.xlu1 %v376_v45 }
 0x34c   :  { %v272_v46 = vpop.xlane.xlu1 %271 }
 0x34d   :  { %377 = vrcp.f32 %v272_v46 }
 0x353   :  { %v378_v47 = vpop.eup %377 }
 0x354   :  { %v277_v48 = vmul.f32 %v378_v47, %v272_v46  ;;  %v274_v49 = vpop.xlane.xlu1 %273 }
 0x355   :  { %379 = vrcp.f32 %v274_v49 }
 0x356   :  { %v279_v50 = vsub.f32 2.0, %v277_v48 }
 0x358   :  { %v281_v51 = vmul.f32 %v378_v47, %v279_v50 }
 0x35a   :  { %v283_v52 = vmul.f32 %v374_v43, %v281_v51 }
 0x35b   :  { %v380_v53 = vpop.eup %379 }
 0x35c   :  { %285 = vst [vmem:[#allocation11] sm:$0xff] %v283_v52  ;;  %v278_v54 = vmul.f32 %v380_v53, %v274_v49 }
 0x35e   :  { %v280_v55 = vsub.f32 2.0, %v278_v54 }
 0x360   :  { %v282_v56 = vmul.f32 %v380_v53, %v280_v55 }
 0x362   :  { %v284_v57 = vmul.f32 %v376_v45, %v282_v56 }
 0x364   :  { %286 = vst [vmem:[#allocation11 + $0x8] sm:$0xff] %v284_v57 }
 0x365   :  { %299 = dma.vmem_to_hbm [thread:$0]  %s292_s8, 256, %s294_s20, [#allocation4], %s541_s21, %s541_s21, %s542_s2  }
 0x366   :  { %531 = dma.done.wait [#allocation4], 256  }
 0x367   :  { %532 = vsyncadd [#allocation4], 4294967040 }
 0x368   :  { %304 = vsyncpa [#allocation3], 1 }
 0x369   :  { %305 = vsyncpa [#allocation6], 1 }
 0x36a   :  { %306 = vsyncpa [#allocation9], 1 }
 0x36b   :  { %307 = vsyncpa [#allocation4], 1 }

</bundles_post_ra>
